<compile_context>
chip_gen: v7x
topology: tpu7x:2x2x1
jax: 0.10.0
libtpu: 0.0.40
codegen_flags: <defaults>
</compile_context>

<pallas_src>
import numpy as np
import jax
import jax.numpy as jnp
from jax.experimental import pallas as pl
from jax.experimental.pallas import tpu as pltpu


def _make_hbm_copy_kernel(row_splits):
    """Kernel factory: whole-slab HBM->HBM copy as a few overlapping DMAs.

    `row_splits` is a static Python list of (start, size) row ranges exactly
    covering the flat (rows, cols) slab.  All DMAs are started first (several
    outstanding descriptors keep the DMA engine saturated), then waited on.
    No VMEM staging, no (8,128) tiling constraints, dtype-agnostic.
    """

    def kernel(x_ref, o_ref, sem):
        copies = [
            pltpu.make_async_copy(
                x_ref.at[pl.ds(start, size)],
                o_ref.at[pl.ds(start, size)],
                sem.at[i],
            )
            for i, (start, size) in enumerate(row_splits)
        ]
        for c in copies:   # issue all DMAs
            c.start()
        for c in copies:   # then block until every one has landed
            c.wait()

    return kernel


class Reshape:
    """JAX/Pallas port of the PyTorch Reshape module.

    forward(x) -> x.view(x.size(0), *shape)
    """

    def __init__(self, shape):
        # shape: tuple, e.g. (3, 32, 32) -- target per-example shape
        self.shape = tuple(int(s) for s in shape)

    def __call__(self, x):
        b = int(x.shape[0])
        n = int(np.prod(x.shape[1:])) if x.ndim > 1 else 1
        n_target = int(np.prod(self.shape)) if self.shape else 1
        assert n == n_target, (
            f"cannot view {x.shape} as (batch, {self.shape}): "
            f"{n} != {n_target}"
        )

        # Glue: metadata-only flatten to a (batch, prod(shape)) slab.  The
        # DMA copy below has no layout constraints, so no lane/sublane
        # re-factoring (and no degenerate fallbacks) is needed.
        x_flat = jnp.reshape(x, (b, n))

        # Split the slab into a few balanced row chunks (static Python ints)
        # so several DMA descriptors are in flight at once.  Ragged splits
        # are fine -- sizes are computed at trace time.
        num_chunks = max(1, min(4, b))
        bounds = [(i * b) // num_chunks for i in range(num_chunks + 1)]
        row_splits = [
            (bounds[i], bounds[i + 1] - bounds[i]) for i in range(num_chunks)
        ]

        itemsize = jnp.dtype(x.dtype).itemsize
        out_flat = pl.pallas_call(
            _make_hbm_copy_kernel(row_splits),
            out_shape=jax.ShapeDtypeStruct((b, n), x.dtype),
            # Raw HBM refs on both sides: the kernel body is a pure DMA,
            # no auto-pipelined VMEM blocks at all.
            in_specs=[pl.BlockSpec(memory_space=pl.ANY)],
            out_specs=pl.BlockSpec(memory_space=pl.ANY),
            scratch_shapes=[pltpu.SemaphoreType.DMA((num_chunks,))],
            cost_estimate=pl.CostEstimate(
                flops=0,
                transcendentals=0,
                bytes_accessed=2 * b * n * itemsize,
            ),
        )(x_flat)

        # Glue: reinterpret as (B, *shape) -- pure metadata, no data movement.
        return jnp.reshape(out_flat, (b,) + self.shape)


if __name__ == "__main__":
    key = jax.random.PRNGKey(0)

    # Input: NCHW (2, 4, 16, 16) -> view as (batch, 16, 64)
    x = jax.random.normal(key, (2, 4, 16, 16), dtype=jnp.float32)

    module = Reshape((16, 64))
    out = jax.block_until_ready(module(x))

    # Reference: plain JAX reshape (same semantics as torch .view on a
    # contiguous tensor).
    ref = jnp.reshape(x, (x.shape[0], 16, 64))

    assert out.shape == (2, 16, 64), out.shape
    assert out.dtype == x.dtype, out.dtype
    np.testing.assert_array_equal(np.asarray(out), np.asarray(ref))

    print("KERNEL_OK")
</pallas_src>

<mosaic_0001>
module attributes {stable_mosaic.version = 11 : i64} {
  func.func @kernel(%arg0: memref<2x1024xf32, #tpu.memory_space<any>>, %arg1: memref<2x1024xf32, #tpu.memory_space<any>>, %arg2: memref<2x!tpu.dma_semaphore, #tpu.memory_space<semaphore_mem>>) attributes {dimension_semantics = [], scalar_prefetch = 0 : i64, scratch_operands = 1 : i64, tpu.core_type = #tpu.core_type<tc>} {
    %c0_i32 = arith.constant 0 : i32
    %c0_i32_0 = arith.constant 0 : i32
    %c0_i32_1 = arith.constant 0 : i32
    %0 = tpu.memref_slice %arg0[%c0_i32_0, %c0_i32_1] : memref<2x1024xf32, #tpu.memory_space<any>> -> memref<1x1024xf32, #tpu.memory_space<any>>
    %c0_i32_2 = arith.constant 0 : i32
    %c0_i32_3 = arith.constant 0 : i32
    %1 = tpu.memref_slice %arg1[%c0_i32_2, %c0_i32_3] : memref<2x1024xf32, #tpu.memory_space<any>> -> memref<1x1024xf32, #tpu.memory_space<any>>
    %2 = tpu.memref_slice %arg2[%c0_i32] : memref<2x!tpu.dma_semaphore, #tpu.memory_space<semaphore_mem>> -> memref<1x!tpu.dma_semaphore, #tpu.memory_space<semaphore_mem>>
    %3 = tpu.memref_squeeze %2 : memref<1x!tpu.dma_semaphore, #tpu.memory_space<semaphore_mem>> -> memref<!tpu.dma_semaphore, #tpu.memory_space<semaphore_mem>>
    tpu.enqueue_dma source(%0 : memref<1x1024xf32, #tpu.memory_space<any>>) target(%1 : memref<1x1024xf32, #tpu.memory_space<any>>) target_semaphore(%3 : memref<!tpu.dma_semaphore, #tpu.memory_space<semaphore_mem>>)
    %c1_i32 = arith.constant 1 : i32
    %c1_i32_4 = arith.constant 1 : i32
    %c0_i32_5 = arith.constant 0 : i32
    %4 = tpu.memref_slice %arg0[%c1_i32_4, %c0_i32_5] : memref<2x1024xf32, #tpu.memory_space<any>> -> memref<1x1024xf32, #tpu.memory_space<any>>
    %c1_i32_6 = arith.constant 1 : i32
    %c0_i32_7 = arith.constant 0 : i32
    %5 = tpu.memref_slice %arg1[%c1_i32_6, %c0_i32_7] : memref<2x1024xf32, #tpu.memory_space<any>> -> memref<1x1024xf32, #tpu.memory_space<any>>
    %6 = tpu.memref_slice %arg2[%c1_i32] : memref<2x!tpu.dma_semaphore, #tpu.memory_space<semaphore_mem>> -> memref<1x!tpu.dma_semaphore, #tpu.memory_space<semaphore_mem>>
    %7 = tpu.memref_squeeze %6 : memref<1x!tpu.dma_semaphore, #tpu.memory_space<semaphore_mem>> -> memref<!tpu.dma_semaphore, #tpu.memory_space<semaphore_mem>>
    tpu.enqueue_dma source(%4 : memref<1x1024xf32, #tpu.memory_space<any>>) target(%5 : memref<1x1024xf32, #tpu.memory_space<any>>) target_semaphore(%7 : memref<!tpu.dma_semaphore, #tpu.memory_space<semaphore_mem>>)
    %c0_i32_8 = arith.constant 0 : i32
    %c0_i32_9 = arith.constant 0 : i32
    %c0_i32_10 = arith.constant 0 : i32
    %8 = tpu.memref_slice %arg0[%c0_i32_9, %c0_i32_10] : memref<2x1024xf32, #tpu.memory_space<any>> -> memref<1x1024xf32, #tpu.memory_space<any>>
    %c0_i32_11 = arith.constant 0 : i32
    %c0_i32_12 = arith.constant 0 : i32
    %9 = tpu.memref_slice %arg1[%c0_i32_11, %c0_i32_12] : memref<2x1024xf32, #tpu.memory_space<any>> -> memref<1x1024xf32, #tpu.memory_space<any>>
    %10 = tpu.memref_slice %arg2[%c0_i32_8] : memref<2x!tpu.dma_semaphore, #tpu.memory_space<semaphore_mem>> -> memref<1x!tpu.dma_semaphore, #tpu.memory_space<semaphore_mem>>
    %11 = tpu.memref_squeeze %10 : memref<1x!tpu.dma_semaphore, #tpu.memory_space<semaphore_mem>> -> memref<!tpu.dma_semaphore, #tpu.memory_space<semaphore_mem>>
    tpu.wait_dma2 semaphore(%11 : memref<!tpu.dma_semaphore, #tpu.memory_space<semaphore_mem>>) src(%8 : memref<1x1024xf32, #tpu.memory_space<any>>) dst(%9 : memref<1x1024xf32, #tpu.memory_space<any>>)
    %c1_i32_13 = arith.constant 1 : i32
    %c1_i32_14 = arith.constant 1 : i32
    %c0_i32_15 = arith.constant 0 : i32
    %12 = tpu.memref_slice %arg0[%c1_i32_14, %c0_i32_15] : memref<2x1024xf32, #tpu.memory_space<any>> -> memref<1x1024xf32, #tpu.memory_space<any>>
    %c1_i32_16 = arith.constant 1 : i32
    %c0_i32_17 = arith.constant 0 : i32
    %13 = tpu.memref_slice %arg1[%c1_i32_16, %c0_i32_17] : memref<2x1024xf32, #tpu.memory_space<any>> -> memref<1x1024xf32, #tpu.memory_space<any>>
    %14 = tpu.memref_slice %arg2[%c1_i32_13] : memref<2x!tpu.dma_semaphore, #tpu.memory_space<semaphore_mem>> -> memref<1x!tpu.dma_semaphore, #tpu.memory_space<semaphore_mem>>
    %15 = tpu.memref_squeeze %14 : memref<1x!tpu.dma_semaphore, #tpu.memory_space<semaphore_mem>> -> memref<!tpu.dma_semaphore, #tpu.memory_space<semaphore_mem>>
    tpu.wait_dma2 semaphore(%15 : memref<!tpu.dma_semaphore, #tpu.memory_space<semaphore_mem>>) src(%12 : memref<1x1024xf32, #tpu.memory_space<any>>) dst(%13 : memref<1x1024xf32, #tpu.memory_space<any>>)
    return
  }
}

</mosaic_0001>

<bundles_post_ra>
// kernel: tpu_custom_call.1
= control target key start
LH: loop header
LB: loop body
LE: loop exit
PB: predicated region body
PF: predicated region fallthrough
CT: control target
= control target key end

     0   :  { %s78_s6 = smov 32   ;;  %s79_s7 = smov 1   ;;  %s107_s0 = inlined_call_operand.hbm [shape: f32[2,1024], index: 0, kind: input, shape index: {}]   ;;  %s108_s1 = inlined_call_operand.hbm [shape: f32[2,1024], index: 1, kind: output, shape index: {}]  }
   0x1   :  { %18 = sst [smem:[#allocation4]] %s78_s6  ;;  %s80_s8 = smov [#allocation2]  }
   0x2   :  { %20 = sst [smem:[#allocation4 + $0x1]] %s78_s6  ;;  %s81_s9 = smov [#allocation3]  }
   0x3   :  { %22 = sst [smem:[#allocation4 + $0x2]] %s79_s7  ;;  %s82_s10 = smov 0  }
   0x4   :  { %24 = dma.general %s107_s0, 128, %s108_s1, %s80_s8, %s81_s9, [#allocation4], %s82_s10, 0  }
   0x5   :  { %40 = sst [smem:[#allocation6]] %s78_s6  ;;  %s25_s17 = scalar_lea.hbm %s107_s0, 16 }
   0x6   :  { %42 = sst [smem:[#allocation6 + $0x1]] %s78_s6  ;;  %s26_s20 = scalar_lea.hbm %s108_s1, 16 }
   0x7   :  { %44 = sst [smem:[#allocation6 + $0x2]] %s79_s7  ;;  %s83_s21 = smov [#allocation2 + $0x1]  }
   0x8   :  { %s84_s22 = smov [#allocation5]  }
   0x9   :  { %46 = dma.general %s25_s17, 128, %s26_s20, %s83_s21, %s84_s22, [#allocation6], %s82_s10, 0  }
   0xa   :  { %74 = dma.done.wait [#allocation2], 128 }
   0xb   :  { %75 = vsyncadd [#allocation2], 4294967168 }
   0xc   :  { %76 = dma.done.wait [#allocation2 + $0x1], 128 }
   0xd   :  { %77 = vsyncadd [#allocation2 + $0x1], 4294967168 }
   0xe   :  { %52 = vsyncmov [#allocation2] }
  0x11   :  { %s53_s23 = vpop.sfrf %52 }
  0x12   :  { %p65_p0 = scmp.ne.s32.totalorder %s53_s23, 0 }
  0x14   :  { %57 = shalt.err (%p65_p0)  }
  0x15   :  { %59 = vsyncmov [#allocation2 + $0x1] }
  0x18   :  { %s60_s24 = vpop.sfrf %59 }
  0x19   :  { %p66_p1 = scmp.ne.s32.totalorder %s60_s24, 0 }
  0x1b   :  { %64 = shalt.err (%p66_p1)  }

</bundles_post_ra>
